<compile_context>
chip_gen: v6e
topology: v6e:2x2x1
jax: 0.10.0
libtpu: 0.0.40
codegen_flags: <defaults>
</compile_context>

<pallas_src>
import math

import jax
import jax.numpy as jnp
from jax.experimental import pallas as pl
from jax.experimental.pallas import tpu as pltpu  # noqa: F401  (TPU backend)

HID_DIM = 32
NUM_HEADS = 4
HEAD_DIM = HID_DIM // NUM_HEADS          # 8
N_TE = 8                                 # "test" points (query branch)
N_TR = 8                                 # "train" points (key/value branch)
BATCH = 2
LN_EPS = 1e-5

NQ = BATCH * N_TE                        # 16 stacked query rows
NK = BATCH * N_TR                        # 16 stacked key/value rows
NR = NQ + 2 * NK                         # 48 stacked activation rows: q | k | v
WIDE = 2 * HID_DIM                       # 64-wide hidden: [mlp_qk hid | mlp_v hid]
PROJ = 3 * HID_DIM                       # 96-wide fused output: [q | k | v]

# ---- row offsets inside the single packed constant slab (SLAB_ROWS, 128) ----
R_W1F = 0                                # 3 * (NR, WIDE) per-feature layer-1 weights
R_B1SEL = R_W1F + 3 * NR                 # (NR, WIDE) layer-1 bias (segment-selected)
R_WFUSED = R_B1SEL + NR                  # (WIDE, PROJ) layer-2 ∘ q/k/v projection
R_BFUSED = R_WFUSED + WIDE               # 3 rows: bq_fused, bk_fused, bv_fused
R_HMASK = R_BFUSED + 8                   # (H*NK, D) per-head block-diagonal mask
R_SBMASK = R_HMASK + NUM_HEADS * NK      # (NQ, H*NK) same-batch logit mask
R_SEGSUM = R_SBMASK + NQ                 # (H*NK, H*NK) per-head-block ones
R_POOL = R_SEGSUM + NUM_HEADS * NK       # (BATCH, NQ) mean-pool matrix
R_WO = R_POOL + 8                        # (D, D) attention output MLP weight
R_MISC = R_WO + HID_DIM                  # 5 rows: bo, ln1_g, ln1_b, ln2_g, ln2_b
R_DECW1 = R_MISC + 8                     # (D, D) decoder layer-1 weight
R_DECMISC = R_DECW1 + HID_DIM            # 3 rows: dec_b1, dec_w2^T, dec_b2 (bcast)
SLAB_ROWS = R_DECMISC + 8                # 496
SLAB_LANES = 128
assert SLAB_ROWS % 8 == 0


# ------------------------------ kernel ------------------------------------ #
def nc1d_kernel(x_ref, w_ref, out_ref):
    f32 = jnp.float32
    D, H = HID_DIM, NUM_HEADS

    def w(r, n, c):
        return w_ref[pl.ds(r, n), pl.ds(0, c)]

    def mm(a, b):
        return jnp.dot(a, b, preferred_element_type=f32)

    def layernorm(t, g, b):
        mu = jnp.mean(t, axis=-1, keepdims=True)
        var = jnp.mean((t - mu) ** 2, axis=-1, keepdims=True)
        return (t - mu) * jax.lax.rsqrt(var + LN_EPS) * g + b

    x = x_ref[...]                                             # (NR, 3)

    # ---- encoder layer 1 for BOTH MLPs at once (wide-hidden, VPU FMAs only) --
    # rows 0..NQ+NK-1 live in hidden cols [0,D) (mlp_qk), v rows in [D,2D).
    h1 = w(R_B1SEL, NR, WIDE)
    h1 = h1 + x[:, 0:1] * w(R_W1F + 0 * NR, NR, WIDE)
    h1 = h1 + x[:, 1:2] * w(R_W1F + 1 * NR, NR, WIDE)
    h1 = h1 + x[:, 2:3] * w(R_W1F + 2 * NR, NR, WIDE)
    h1 = jnp.maximum(h1, 0.0)

    # ---- encoder layer 2 fused (at pack time) with q/k/v projections: 1 matmul
    P = mm(h1, w(R_WFUSED, WIDE, PROJ))                        # (NR, PROJ)
    q = P[0:NQ, 0:D] + w(R_BFUSED + 0, 1, D)                   # (NQ, D)
    k = P[NQ:NQ + NK, D:2 * D] + w(R_BFUSED + 1, 1, D)         # 1/sqrt(D) folded in
    v = P[NQ + NK:NR, 2 * D:3 * D] + w(R_BFUSED + 2, 1, D)     # (NK, D)

    # ---- all-head, all-batch attention via block-diagonal masked matmuls -----
    head_mask = w(R_HMASK, H * NK, D)                          # precomputed 0/1
    kbd = jnp.concatenate([k] * H, axis=0) * head_mask         # (H*NK, D)
    vbd = jnp.concatenate([v] * H, axis=0) * head_mask         # (H*NK, D)

    logits = jax.lax.dot_general(q, kbd, (((1,), (1,)), ((), ())),
                                 preferred_element_type=f32)   # (NQ, H*NK)
    logits = logits - jnp.max(logits, axis=-1, keepdims=True)  # per-row shift
    e = jnp.exp(logits) * w(R_SBMASK, NQ, H * NK)              # drop cross-batch keys

    denom = mm(e, w(R_SEGSUM, H * NK, H * NK))                 # per-head-block sums
    att = mm(e / denom, vbd)                                   # (NQ, D), exact recip

    # ---- MultiHeadAttention residual + LayerNorms ----------------------------
    out1 = layernorm(q + att, w(R_MISC + 1, 1, D), w(R_MISC + 2, 1, D))
    ff = jnp.maximum(mm(out1, w(R_WO, D, D)) + w(R_MISC + 0, 1, D), 0.0)
    out2 = layernorm(out1 + ff, w(R_MISC + 3, 1, D), w(R_MISC + 4, 1, D))

    # ---- MeanPool (per batch element) + decoder fc_stack(2, D, D, 1) ---------
    pooled = mm(w(R_POOL, BATCH, NQ), out2)                    # (B, D)
    h_dec = jnp.maximum(mm(pooled, w(R_DECW1, D, D)) + w(R_DECMISC + 0, 1, D), 0.0)
    y = jnp.sum(h_dec * w(R_DECMISC + 1, 1, D), axis=-1, keepdims=True)
    out_ref[...] = y + w(R_DECMISC + 2, 1, D)[:, 0:1]          # (B, 1)


# ------------------------------ wrapper ------------------------------------ #
@jax.jit
def neural_complexity_1d(inputs, wslab):
    B = inputs["te_xp"].shape[0]
    assert B == BATCH, "kernel constants are specialised for batch_size=2"

    # Layout plumbing (outside the kernel): stack te|tr|xyp into ONE lane-packed
    # activation slab so the kernel sees a single input DMA.
    te = inputs["te_xp"].reshape(B * N_TE, 2)
    tr = inputs["tr_xp"].reshape(B * N_TR, 2)
    xyp = inputs["tr_xyp"].reshape(B * N_TR, 3)
    qk = jnp.pad(jnp.concatenate([te, tr], axis=0), ((0, 0), (0, 1)))
    x = jnp.concatenate([qk, xyp], axis=0).astype(jnp.float32)       # (NR, 3)

    # Grid-free call: everything resident in VMEM, single kernel invocation,
    # 2 input DMAs + 1 output DMA total.  No vmem_limit / pipelining tuning
    # needed: total footprint < 300 KiB on v5e/v6e/v7x.
    return pl.pallas_call(
        nc1d_kernel,
        out_shape=jax.ShapeDtypeStruct((B, 1), jnp.float32),
    )(x, wslab)


# ------------------------------ params ------------------------------------- #
def init_params(key, dim=HID_DIM):
    ks = jax.random.split(key, 20)

    def u(k, shape, fan_in):
        bound = 1.0 / math.sqrt(fan_in)
        return jax.random.uniform(k, shape, jnp.float32, -bound, bound)

    p = {}
    p["qk_w1"] = u(ks[0], (2, dim), 2);     p["qk_b1"] = u(ks[1], (1, dim), 2)
    p["qk_w2"] = u(ks[2], (dim, dim), dim); p["qk_b2"] = u(ks[3], (1, dim), dim)
    p["v_w1"] = u(ks[4], (3, dim), 3);      p["v_b1"] = u(ks[5], (1, dim), 3)
    p["v_w2"] = u(ks[6], (dim, dim), dim);  p["v_b2"] = u(ks[7], (1, dim), dim)
    p["wq"] = u(ks[8], (dim, dim), dim)
    p["wk"] = u(ks[9], (dim, dim), dim)
    p["wv"] = u(ks[10], (dim, dim), dim)
    p["wo"] = u(ks[11], (dim, dim), dim);   p["bo"] = u(ks[12], (1, dim), dim)
    p["ln1_g"] = jnp.ones((1, dim), jnp.float32)
    p["ln1_b"] = jnp.zeros((1, dim), jnp.float32)
    p["ln2_g"] = jnp.ones((1, dim), jnp.float32)
    p["ln2_b"] = jnp.zeros((1, dim), jnp.float32)
    p["dec_w1"] = u(ks[13], (dim, dim), dim); p["dec_b1"] = u(ks[14], (1, dim), dim)
    p["dec_w2"] = u(ks[15], (dim, 1), dim);   p["dec_b2"] = u(ks[16], (1, 1), dim)
    return p


def pack_params(p, dim=HID_DIM):
    """Pack all weights/biases/LN params + constant masks into ONE slab.

    Pack-time transforms (all one-time, outside the kernel):
      * 1/sqrt(D) softmax scale folded into the K branch.  Valid ONLY because k
        feeds nothing but the attention logits — unfold if wk is ever reused.
      * encoder layer-2 composed with the bias-free q/k/v projections
        (linear∘linear), so the kernel runs them as a single matmul.
      * constant 0/1 masks (head / same-batch / segment-sum / pool) precomputed.
    """
    f32 = jnp.float32
    scale = 1.0 / math.sqrt(dim)
    wk_s = p["wk"] * scale

    def rows(a):
        return jnp.asarray(a, f32).reshape(-1, dim)

    zD = jnp.zeros((dim,), f32)
    zDD = jnp.zeros((dim, dim), f32)

    # --- layer 1, wide hidden: cols [0,D) = mlp_qk hidden, [D,2D) = mlp_v hidden
    def feat_slab(c):
        qk_row = p["qk_w1"][c] if c < 2 else zD        # mlp_qk has 2 input features
        top = jnp.concatenate([qk_row, zD]).reshape(1, WIDE)
        bot = jnp.concatenate([zD, p["v_w1"][c]]).reshape(1, WIDE)
        return jnp.concatenate([jnp.tile(top, (NQ + NK, 1)),
                                jnp.tile(bot, (NK, 1))], axis=0)       # (NR, WIDE)

    b1_top = jnp.concatenate([rows(p["qk_b1"])[0], zD]).reshape(1, WIDE)
    b1_bot = jnp.concatenate([zD, rows(p["v_b1"])[0]]).reshape(1, WIDE)
    b1sel = jnp.concatenate([jnp.tile(b1_top, (NQ + NK, 1)),
                             jnp.tile(b1_bot, (NK, 1))], axis=0)       # (NR, WIDE)

    # --- layer 2 ∘ projection fusion (q | k | v column blocks) ---------------
    wq_f = p["qk_w2"] @ p["wq"]
    wk_f = p["qk_w2"] @ wk_s
    wv_f = p["v_w2"] @ p["wv"]
    bq_f = p["qk_b2"] @ p["wq"]
    bk_f = p["qk_b2"] @ wk_s
    bv_f = p["v_b2"] @ p["wv"]
    wfused = jnp.concatenate([
        jnp.concatenate([wq_f, wk_f, zDD], axis=1),
        jnp.concatenate([zDD, zDD, wv_f], axis=1)], axis=0)            # (WIDE, PROJ)

    # --- constant masks -------------------------------------------------------
    def iota2(n, m, axis):
        return jax.lax.broadcasted_iota(jnp.int32, (n, m), axis)

    hm = (iota2(NUM_HEADS * NK, dim, 0) // NK ==
          iota2(NUM_HEADS * NK, dim, 1) // HEAD_DIM)                   # (H*NK, D)
    sb = (iota2(NQ, NUM_HEADS * NK, 0) // N_TE ==
          (iota2(NQ, NUM_HEADS * NK, 1) // N_TR) % BATCH)              # (NQ, H*NK)
    seg = (iota2(NUM_HEADS * NK, NUM_HEADS * NK, 0) // NK ==
           iota2(NUM_HEADS * NK, NUM_HEADS * NK, 1) // NK)             # (H*NK, H*NK)
    pool = (iota2(BATCH, NQ, 0) == iota2(BATCH, NQ, 1) // N_TE)        # (B, NQ)

    # --- assemble the single (SLAB_ROWS, 128) slab ----------------------------
    slab = jnp.zeros((SLAB_ROWS, SLAB_LANES), f32)

    def put(s, r, a):
        a = jnp.asarray(a, f32)
        return s.at[r:r + a.shape[0], 0:a.shape[1]].set(a)

    slab = put(slab, R_W1F + 0 * NR, feat_slab(0))
    slab = put(slab, R_W1F + 1 * NR, feat_slab(1))
    slab = put(slab, R_W1F + 2 * NR, feat_slab(2))
    slab = put(slab, R_B1SEL, b1sel)
    slab = put(slab, R_WFUSED, wfused)
    slab = put(slab, R_BFUSED + 0, rows(bq_f))
    slab = put(slab, R_BFUSED + 1, rows(bk_f))
    slab = put(slab, R_BFUSED + 2, rows(bv_f))
    slab = put(slab, R_HMASK, hm.astype(f32))
    slab = put(slab, R_SBMASK, sb.astype(f32))
    slab = put(slab, R_SEGSUM, seg.astype(f32))
    slab = put(slab, R_POOL, pool.astype(f32) / N_TE)
    slab = put(slab, R_WO, p["wo"])
    slab = put(slab, R_MISC + 0, rows(p["bo"]))
    slab = put(slab, R_MISC + 1, rows(p["ln1_g"]))
    slab = put(slab, R_MISC + 2, rows(p["ln1_b"]))
    slab = put(slab, R_MISC + 3, rows(p["ln2_g"]))
    slab = put(slab, R_MISC + 4, rows(p["ln2_b"]))
    slab = put(slab, R_DECW1, p["dec_w1"])
    slab = put(slab, R_DECMISC + 0, rows(p["dec_b1"]))
    slab = put(slab, R_DECMISC + 1, p["dec_w2"].T.reshape(1, dim))
    slab = put(slab, R_DECMISC + 2, jnp.full((1, dim), p["dec_b2"][0, 0], f32))
    return slab


# ------------------------------ reference ---------------------------------- #
def reference_forward(inputs, p):
    def mlp2(x, w1, b1, w2, b2):
        return jnp.maximum(x @ w1 + b1, 0.0) @ w2 + b2

    def ln(x, g, b):
        mu = x.mean(-1, keepdims=True)
        var = ((x - mu) ** 2).mean(-1, keepdims=True)
        return (x - mu) / jnp.sqrt(var + LN_EPS) * g + b

    q = mlp2(inputs["te_xp"], p["qk_w1"], p["qk_b1"], p["qk_w2"], p["qk_b2"])
    k = mlp2(inputs["tr_xp"], p["qk_w1"], p["qk_b1"], p["qk_w2"], p["qk_b2"])
    v = mlp2(inputs["tr_xyp"], p["v_w1"], p["v_b1"], p["v_w2"], p["v_b2"])
    q, k, v = q @ p["wq"], k @ p["wk"], v @ p["wv"]

    B, Nq, D = q.shape
    dh = D // NUM_HEADS
    qh = q.reshape(B, Nq, NUM_HEADS, dh).transpose(0, 2, 1, 3)
    kh = k.reshape(B, -1, NUM_HEADS, dh).transpose(0, 2, 1, 3)
    vh = v.reshape(B, -1, NUM_HEADS, dh).transpose(0, 2, 1, 3)
    a = jax.nn.softmax(jnp.einsum("bhqd,bhkd->bhqk", qh, kh) / math.sqrt(D), -1)
    att = jnp.einsum("bhqk,bhkd->bhqd", a, vh).transpose(0, 2, 1, 3).reshape(B, Nq, D)

    out = ln(q + att, p["ln1_g"], p["ln1_b"])
    out = ln(out + jnp.maximum(out @ p["wo"] + p["bo"], 0.0), p["ln2_g"], p["ln2_b"])
    pooled = out.mean(1)
    return mlp2(pooled, p["dec_w1"], p["dec_b1"], p["dec_w2"], p["dec_b2"])


# ------------------------------ main ---------------------------------------- #
if __name__ == "__main__":
    key = jax.random.PRNGKey(0)
    k_par, k_te, k_tr, k_xyp = jax.random.split(key, 4)

    params = init_params(k_par)
    wslab = pack_params(params)
    inputs = {
        "te_xp": jax.random.normal(k_te, (BATCH, N_TE, 2), jnp.float32),
        "tr_xp": jax.random.normal(k_tr, (BATCH, N_TR, 2), jnp.float32),
        "tr_xyp": jax.random.normal(k_xyp, (BATCH, N_TR, 3), jnp.float32),
    }

    out = neural_complexity_1d(inputs, wslab)
    out = jax.block_until_ready(out)

    ref = reference_forward(inputs, params)
    assert out.shape == (BATCH, 1), out.shape
    # Softmax reciprocal is now exact; tolerance covers only fp32 reassociation
    # from the pack-time (layer-2 ∘ projection) weight composition.
    assert jnp.allclose(out, ref, atol=2e-3, rtol=2e-3), (out, ref)

    print("KERNEL_OK")
</pallas_src>

<mosaic_0001>
module attributes {stable_mosaic.version = 11 : i64} {
  func.func @nc1d_kernel(%arg0: memref<48x3xf32, #tpu.memory_space<vmem>>, %arg1: memref<496x128xf32, #tpu.memory_space<vmem>>, %arg2: memref<2x1xf32, #tpu.memory_space<vmem>>) attributes {dimension_semantics = [], scalar_prefetch = 0 : i64, scratch_operands = 0 : i64, tpu.core_type = #tpu.core_type<tc>} {
    %c0 = arith.constant 0 : index
    %c0_0 = arith.constant 0 : index
    %0 = vector.load %arg0[%c0, %c0_0] : memref<48x3xf32, #tpu.memory_space<vmem>>, vector<48x3xf32>
    %c144 = arith.constant 144 : index
    %c0_1 = arith.constant 0 : index
    %1 = vector.load %arg1[%c144, %c0_1] : memref<496x128xf32, #tpu.memory_space<vmem>>, vector<48x64xf32>
    %2 = vector.extract_strided_slice %0 {offsets = [0, 0], sizes = [48, 1], strides = [1, 1]} : vector<48x3xf32> to vector<48x1xf32>
    %c0_2 = arith.constant 0 : index
    %c0_3 = arith.constant 0 : index
    %3 = vector.load %arg1[%c0_2, %c0_3] : memref<496x128xf32, #tpu.memory_space<vmem>>, vector<48x64xf32>
    %4 = vector.broadcast %2 : vector<48x1xf32> to vector<48x64xf32>
    %5 = arith.mulf %4, %3 : vector<48x64xf32>
    %6 = arith.addf %1, %5 : vector<48x64xf32>
    %7 = vector.extract_strided_slice %0 {offsets = [0, 1], sizes = [48, 1], strides = [1, 1]} : vector<48x3xf32> to vector<48x1xf32>
    %c48 = arith.constant 48 : index
    %c0_4 = arith.constant 0 : index
    %8 = vector.load %arg1[%c48, %c0_4] : memref<496x128xf32, #tpu.memory_space<vmem>>, vector<48x64xf32>
    %9 = vector.broadcast %7 : vector<48x1xf32> to vector<48x64xf32>
    %10 = arith.mulf %9, %8 : vector<48x64xf32>
    %11 = arith.addf %6, %10 : vector<48x64xf32>
    %12 = vector.extract_strided_slice %0 {offsets = [0, 2], sizes = [48, 1], strides = [1, 1]} : vector<48x3xf32> to vector<48x1xf32>
    %c96 = arith.constant 96 : index
    %c0_5 = arith.constant 0 : index
    %13 = vector.load %arg1[%c96, %c0_5] : memref<496x128xf32, #tpu.memory_space<vmem>>, vector<48x64xf32>
    %14 = vector.broadcast %12 : vector<48x1xf32> to vector<48x64xf32>
    %15 = arith.mulf %14, %13 : vector<48x64xf32>
    %16 = arith.addf %11, %15 : vector<48x64xf32>
    %cst = arith.constant 0.000000e+00 : f32
    %17 = vector.broadcast %cst : f32 to vector<48x64xf32>
    %18 = arith.maximumf %16, %17 : vector<48x64xf32>
    %c192 = arith.constant 192 : index
    %c0_6 = arith.constant 0 : index
    %19 = vector.load %arg1[%c192, %c0_6] : memref<496x128xf32, #tpu.memory_space<vmem>>, vector<64x96xf32>
    %cst_7 = arith.constant dense<0.000000e+00> : vector<48x96xf32>
    %20 = tpu.matmul %18, %19, %cst_7 {dimension_numbers = #tpu.dot_dimension_numbers<[1], [0], [0], [1], [0, 0, 1, 1], [], []>} : vector<48x64xf32>, vector<64x96xf32>, vector<48x96xf32> -> vector<48x96xf32>
    %21 = vector.extract_strided_slice %20 {offsets = [0, 0], sizes = [16, 32], strides = [1, 1]} : vector<48x96xf32> to vector<16x32xf32>
    %c256 = arith.constant 256 : index
    %c0_8 = arith.constant 0 : index
    %22 = vector.load %arg1[%c256, %c0_8] : memref<496x128xf32, #tpu.memory_space<vmem>>, vector<1x32xf32>
    %23 = vector.broadcast %22 : vector<1x32xf32> to vector<16x32xf32>
    %24 = arith.addf %21, %23 : vector<16x32xf32>
    %25 = vector.extract_strided_slice %20 {offsets = [16, 32], sizes = [16, 32], strides = [1, 1]} : vector<48x96xf32> to vector<16x32xf32>
    %c257 = arith.constant 257 : index
    %c0_9 = arith.constant 0 : index
    %26 = vector.load %arg1[%c257, %c0_9] : memref<496x128xf32, #tpu.memory_space<vmem>>, vector<1x32xf32>
    %27 = vector.broadcast %26 : vector<1x32xf32> to vector<16x32xf32>
    %28 = arith.addf %25, %27 : vector<16x32xf32>
    %29 = vector.extract_strided_slice %20 {offsets = [32, 64], sizes = [16, 32], strides = [1, 1]} : vector<48x96xf32> to vector<16x32xf32>
    %c258 = arith.constant 258 : index
    %c0_10 = arith.constant 0 : index
    %30 = vector.load %arg1[%c258, %c0_10] : memref<496x128xf32, #tpu.memory_space<vmem>>, vector<1x32xf32>
    %31 = vector.broadcast %30 : vector<1x32xf32> to vector<16x32xf32>
    %32 = arith.addf %29, %31 : vector<16x32xf32>
    %c264 = arith.constant 264 : index
    %c0_11 = arith.constant 0 : index
    %33 = vector.load %arg1[%c264, %c0_11] : memref<496x128xf32, #tpu.memory_space<vmem>>, vector<64x32xf32>
    %34 = tpu.concatenate %28, %28, %28, %28 in 0 : vector<16x32xf32>, vector<16x32xf32>, vector<16x32xf32>, vector<16x32xf32> -> vector<64x32xf32>
    %35 = arith.mulf %34, %33 : vector<64x32xf32>
    %36 = tpu.concatenate %32, %32, %32, %32 in 0 : vector<16x32xf32>, vector<16x32xf32>, vector<16x32xf32>, vector<16x32xf32> -> vector<64x32xf32>
    %37 = arith.mulf %36, %33 : vector<64x32xf32>
    %cst_12 = arith.constant dense<0.000000e+00> : vector<16x64xf32>
    %38 = tpu.matmul %24, %35, %cst_12 {dimension_numbers = #tpu.dot_dimension_numbers<[1], [1], [0], [0], [0, 0, 1, 0], [], []>} : vector<16x32xf32>, vector<64x32xf32>, vector<16x64xf32> -> vector<16x64xf32>
    %cst_13 = arith.constant dense<0xFF800000> : vector<16xf32>
    %39 = vector.multi_reduction <maximumf>, %38, %cst_13 [1] : vector<16x64xf32> to vector<16xf32>
    %40 = vector.shape_cast %39 : vector<16xf32> to vector<16x1xf32>
    %41 = vector.broadcast %40 : vector<16x1xf32> to vector<16x64xf32>
    %42 = arith.subf %38, %41 : vector<16x64xf32>
    %43 = math.exp %42 : vector<16x64xf32>
    %c328 = arith.constant 328 : index
    %c0_14 = arith.constant 0 : index
    %44 = vector.load %arg1[%c328, %c0_14] : memref<496x128xf32, #tpu.memory_space<vmem>>, vector<16x64xf32>
    %45 = arith.mulf %43, %44 : vector<16x64xf32>
    %c344 = arith.constant 344 : index
    %c0_15 = arith.constant 0 : index
    %46 = vector.load %arg1[%c344, %c0_15] : memref<496x128xf32, #tpu.memory_space<vmem>>, vector<64x64xf32>
    %cst_16 = arith.constant dense<0.000000e+00> : vector<16x64xf32>
    %47 = tpu.matmul %45, %46, %cst_16 {dimension_numbers = #tpu.dot_dimension_numbers<[1], [0], [0], [1], [0, 0, 1, 1], [], []>} : vector<16x64xf32>, vector<64x64xf32>, vector<16x64xf32> -> vector<16x64xf32>
    %48 = arith.divf %45, %47 : vector<16x64xf32>
    %cst_17 = arith.constant dense<0.000000e+00> : vector<16x32xf32>
    %49 = tpu.matmul %48, %37, %cst_17 {dimension_numbers = #tpu.dot_dimension_numbers<[1], [0], [0], [1], [0, 0, 1, 1], [], []>} : vector<16x64xf32>, vector<64x32xf32>, vector<16x32xf32> -> vector<16x32xf32>
    %50 = arith.addf %24, %49 : vector<16x32xf32>
    %c449 = arith.constant 449 : index
    %c0_18 = arith.constant 0 : index
    %51 = vector.load %arg1[%c449, %c0_18] : memref<496x128xf32, #tpu.memory_space<vmem>>, vector<1x32xf32>
    %c450 = arith.constant 450 : index
    %c0_19 = arith.constant 0 : index
    %52 = vector.load %arg1[%c450, %c0_19] : memref<496x128xf32, #tpu.memory_space<vmem>>, vector<1x32xf32>
    %cst_20 = arith.constant dense<0.000000e+00> : vector<16xf32>
    %53 = vector.multi_reduction <add>, %50, %cst_20 [1] : vector<16x32xf32> to vector<16xf32>
    %54 = vector.shape_cast %53 : vector<16xf32> to vector<16x1xf32>
    %cst_21 = arith.constant 3.200000e+01 : f32
    %55 = vector.broadcast %cst_21 : f32 to vector<16x1xf32>
    %56 = arith.divf %54, %55 : vector<16x1xf32>
    %57 = vector.broadcast %56 : vector<16x1xf32> to vector<16x32xf32>
    %58 = arith.subf %50, %57 : vector<16x32xf32>
    %59 = arith.mulf %58, %58 : vector<16x32xf32>
    %cst_22 = arith.constant dense<0.000000e+00> : vector<16xf32>
    %60 = vector.multi_reduction <add>, %59, %cst_22 [1] : vector<16x32xf32> to vector<16xf32>
    %61 = vector.shape_cast %60 : vector<16xf32> to vector<16x1xf32>
    %cst_23 = arith.constant 3.200000e+01 : f32
    %62 = vector.broadcast %cst_23 : f32 to vector<16x1xf32>
    %63 = arith.divf %61, %62 : vector<16x1xf32>
    %64 = vector.broadcast %56 : vector<16x1xf32> to vector<16x32xf32>
    %65 = arith.subf %50, %64 : vector<16x32xf32>
    %cst_24 = arith.constant 9.99999974E-6 : f32
    %66 = vector.broadcast %cst_24 : f32 to vector<16x1xf32>
    %67 = arith.addf %63, %66 : vector<16x1xf32>
    %68 = math.rsqrt %67 : vector<16x1xf32>
    %69 = vector.broadcast %68 : vector<16x1xf32> to vector<16x32xf32>
    %70 = arith.mulf %65, %69 : vector<16x32xf32>
    %71 = vector.broadcast %51 : vector<1x32xf32> to vector<16x32xf32>
    %72 = arith.mulf %70, %71 : vector<16x32xf32>
    %73 = vector.broadcast %52 : vector<1x32xf32> to vector<16x32xf32>
    %74 = arith.addf %72, %73 : vector<16x32xf32>
    %c416 = arith.constant 416 : index
    %c0_25 = arith.constant 0 : index
    %75 = vector.load %arg1[%c416, %c0_25] : memref<496x128xf32, #tpu.memory_space<vmem>>, vector<32x32xf32>
    %cst_26 = arith.constant dense<0.000000e+00> : vector<16x32xf32>
    %76 = tpu.matmul %74, %75, %cst_26 {dimension_numbers = #tpu.dot_dimension_numbers<[1], [0], [0], [1], [0, 0, 1, 1], [], []>} : vector<16x32xf32>, vector<32x32xf32>, vector<16x32xf32> -> vector<16x32xf32>
    %c448 = arith.constant 448 : index
    %c0_27 = arith.constant 0 : index
    %77 = vector.load %arg1[%c448, %c0_27] : memref<496x128xf32, #tpu.memory_space<vmem>>, vector<1x32xf32>
    %78 = vector.broadcast %77 : vector<1x32xf32> to vector<16x32xf32>
    %79 = arith.addf %76, %78 : vector<16x32xf32>
    %cst_28 = arith.constant 0.000000e+00 : f32
    %80 = vector.broadcast %cst_28 : f32 to vector<16x32xf32>
    %81 = arith.maximumf %79, %80 : vector<16x32xf32>
    %82 = arith.addf %74, %81 : vector<16x32xf32>
    %c451 = arith.constant 451 : index
    %c0_29 = arith.constant 0 : index
    %83 = vector.load %arg1[%c451, %c0_29] : memref<496x128xf32, #tpu.memory_space<vmem>>, vector<1x32xf32>
    %c452 = arith.constant 452 : index
    %c0_30 = arith.constant 0 : index
    %84 = vector.load %arg1[%c452, %c0_30] : memref<496x128xf32, #tpu.memory_space<vmem>>, vector<1x32xf32>
    %cst_31 = arith.constant dense<0.000000e+00> : vector<16xf32>
    %85 = vector.multi_reduction <add>, %82, %cst_31 [1] : vector<16x32xf32> to vector<16xf32>
    %86 = vector.shape_cast %85 : vector<16xf32> to vector<16x1xf32>
    %cst_32 = arith.constant 3.200000e+01 : f32
    %87 = vector.broadcast %cst_32 : f32 to vector<16x1xf32>
    %88 = arith.divf %86, %87 : vector<16x1xf32>
    %89 = vector.broadcast %88 : vector<16x1xf32> to vector<16x32xf32>
    %90 = arith.subf %82, %89 : vector<16x32xf32>
    %91 = arith.mulf %90, %90 : vector<16x32xf32>
    %cst_33 = arith.constant dense<0.000000e+00> : vector<16xf32>
    %92 = vector.multi_reduction <add>, %91, %cst_33 [1] : vector<16x32xf32> to vector<16xf32>
    %93 = vector.shape_cast %92 : vector<16xf32> to vector<16x1xf32>
    %cst_34 = arith.constant 3.200000e+01 : f32
    %94 = vector.broadcast %cst_34 : f32 to vector<16x1xf32>
    %95 = arith.divf %93, %94 : vector<16x1xf32>
    %96 = vector.broadcast %88 : vector<16x1xf32> to vector<16x32xf32>
    %97 = arith.subf %82, %96 : vector<16x32xf32>
    %cst_35 = arith.constant 9.99999974E-6 : f32
    %98 = vector.broadcast %cst_35 : f32 to vector<16x1xf32>
    %99 = arith.addf %95, %98 : vector<16x1xf32>
    %100 = math.rsqrt %99 : vector<16x1xf32>
    %101 = vector.broadcast %100 : vector<16x1xf32> to vector<16x32xf32>
    %102 = arith.mulf %97, %101 : vector<16x32xf32>
    %103 = vector.broadcast %83 : vector<1x32xf32> to vector<16x32xf32>
    %104 = arith.mulf %102, %103 : vector<16x32xf32>
    %105 = vector.broadcast %84 : vector<1x32xf32> to vector<16x32xf32>
    %106 = arith.addf %104, %105 : vector<16x32xf32>
    %c408 = arith.constant 408 : index
    %c0_36 = arith.constant 0 : index
    %107 = vector.load %arg1[%c408, %c0_36] : memref<496x128xf32, #tpu.memory_space<vmem>>, vector<2x16xf32>
    %cst_37 = arith.constant dense<0.000000e+00> : vector<2x32xf32>
    %108 = tpu.matmul %107, %106, %cst_37 {dimension_numbers = #tpu.dot_dimension_numbers<[1], [0], [0], [1], [0, 0, 1, 1], [], []>} : vector<2x16xf32>, vector<16x32xf32>, vector<2x32xf32> -> vector<2x32xf32>
    %c456 = arith.constant 456 : index
    %c0_38 = arith.constant 0 : index
    %109 = vector.load %arg1[%c456, %c0_38] : memref<496x128xf32, #tpu.memory_space<vmem>>, vector<32x32xf32>
    %cst_39 = arith.constant dense<0.000000e+00> : vector<2x32xf32>
    %110 = tpu.matmul %108, %109, %cst_39 {dimension_numbers = #tpu.dot_dimension_numbers<[1], [0], [0], [1], [0, 0, 1, 1], [], []>} : vector<2x32xf32>, vector<32x32xf32>, vector<2x32xf32> -> vector<2x32xf32>
    %c488 = arith.constant 488 : index
    %c0_40 = arith.constant 0 : index
    %111 = vector.load %arg1[%c488, %c0_40] : memref<496x128xf32, #tpu.memory_space<vmem>>, vector<1x32xf32>
    %112 = vector.broadcast %111 : vector<1x32xf32> to vector<2x32xf32>
    %113 = arith.addf %110, %112 : vector<2x32xf32>
    %cst_41 = arith.constant 0.000000e+00 : f32
    %114 = vector.broadcast %cst_41 : f32 to vector<2x32xf32>
    %115 = arith.maximumf %113, %114 : vector<2x32xf32>
    %c489 = arith.constant 489 : index
    %c0_42 = arith.constant 0 : index
    %116 = vector.load %arg1[%c489, %c0_42] : memref<496x128xf32, #tpu.memory_space<vmem>>, vector<1x32xf32>
    %117 = vector.broadcast %116 : vector<1x32xf32> to vector<2x32xf32>
    %118 = arith.mulf %115, %117 : vector<2x32xf32>
    %cst_43 = arith.constant dense<0.000000e+00> : vector<2xf32>
    %119 = vector.multi_reduction <add>, %118, %cst_43 [1] : vector<2x32xf32> to vector<2xf32>
    %120 = vector.shape_cast %119 : vector<2xf32> to vector<2x1xf32>
    %c490 = arith.constant 490 : index
    %c0_44 = arith.constant 0 : index
    %121 = vector.load %arg1[%c490, %c0_44] : memref<496x128xf32, #tpu.memory_space<vmem>>, vector<1x32xf32>
    %122 = vector.extract_strided_slice %121 {offsets = [0, 0], sizes = [1, 1], strides = [1, 1]} : vector<1x32xf32> to vector<1x1xf32>
    %123 = vector.broadcast %122 : vector<1x1xf32> to vector<2x1xf32>
    %124 = arith.addf %120, %123 : vector<2x1xf32>
    %c0_45 = arith.constant 0 : index
    %c0_46 = arith.constant 0 : index
    %125 = vector.load %arg2[%c0_45, %c0_46] : memref<2x1xf32, #tpu.memory_space<vmem>>, vector<2x1xf32>
    tpu.vector_store %arg2[%c0_45, %c0_46], %124 {strides = array<i32>} : memref<2x1xf32, #tpu.memory_space<vmem>>, vector<2x1xf32>,
    return
  }
}

</mosaic_0001>

<bundles_post_ra>
// kernel: neural_complexity_1d.1
= control target key start
LH: loop header
LB: loop body
LE: loop exit
PB: predicated region body
PF: predicated region fallthrough
CT: control target
= control target key end

     0   :  { %7 = vsyncpa [#allocation3], 0  ;;  %s1373_s9 = smov [#allocation2]   ;;  %s1532_s0 = inlined_call_operand.vmem [shape: f32[48,3], index: 0, kind: input, shape index: {}]   ;;  %s1533_s1 = inlined_call_operand.hbm [shape: f32[496,128], index: 1, kind: input, shape index: {}]   ;;  %s1534_s2 = inlined_call_operand.vmem [shape: f32[2,1], index: 2, kind: output, shape index: {}]  }
   0x1   :  { %s15_s10 = sshll.u32 %s1373_s9, 4  ;;  %s16_s10 = int_to_ptr.vmem [resolvable:$true] %s15_s10 }
   0x2   :  { %s1359_s11 = scalar_lea.vmem %s16_s10, 7936  ;;  %p1364_p1 = scmp.lt.s32.totalorder %s16_s10, %s16_s10 }
   0x3   :  { %p1360_p0 = scmp.ne.s32.totalorder %s16_s10, %s1359_s11  ;;  %p1365_p2 = scmp.lt.s32.totalorder %s1359_s11, %s1359_s11 }
   0x5   :  { %p1366_p3 = por %p1365_p2, %p1364_p1 }
   0x7   :  { %p1367_p4 = pnand %p1366_p3, %p1360_p0 }
   0x9   :  { %1370 = shalt.err (!%p1367_p4)
}
   0xa   :  { %s1374_s12 = smov 128   ;;  %s1375_s13 = smov 8  }
   0xb   :  { %21 = dma.hbm_to_vmem [thread:$0]  %s1533_s1, 7936, %s16_s10, [#allocation3], %s1374_s12, %s1374_s12, %s1375_s13  }
   0xc   :  { %1371 = dma.done.wait [#allocation3], 7936  }
   0xd   :  { %1372 = vsyncadd [#allocation3], 4294959360  ;;  %v1376_v0 = vmov 1   ;;  %v1377_v1 = vmov 0   ;;  %v25_v2 = vld [vmem:[%s1532_s0] sm:$0xff]  ;;  %v26_v3 = vld [vmem:[%s1532_s0 + $0x8] sm:$0xff] }
   0xe   :  { %1324 = vset.pattern.permute.xlu1 %v1376_v0  ;;  %1323 = vset.pattern.permute.xlu0 %v1377_v1  ;;  %v182_v4 = vld [vmem:[#allocation2 + $0xf8] sm:$0xff]  ;;  %v181_v5 = vld [vmem:[#allocation2 + $0xf0] sm:$0xff]  ;;  %v180_v6 = vld [vmem:[#allocation2 + $0xe8] sm:$0xff]  ;;  %v1378_v9 = vmov 2   ;;  %s1379_s23 = smov 32   ;;  %vm183_vm0 = vcmask 523264  }
   0xf   :  { %92 = vperm.xlu1 %1324, %v25_v2   ;;  %45 = vperm.xlu0 %1323, %v25_v2   ;;  %v27_v7 = vld [vmem:[%s1532_s0 + $0x10] sm:$0xff]  ;;  %v179_v8 = vld [vmem:[#allocation2 + $0xe0] sm:$0xff]  ;;  %v28_v10 = vld [vmem:[%s1532_s0 + $0x18] sm:$0xff]  ;;  %vm430_vm1 = vcmask 261120   ;;  %s1380_s24 = smov 96   ;;  %vm1383_vm2 = vmmov 0  }
  0x10   :  { %1201 = vmatprep.subr.mxu0 %v182_v4  ;;  %v178_v11 = vld [vmem:[#allocation2 + $0xd8] sm:$0xff]  ;;  %v177_v12 = vld [vmem:[#allocation2 + $0xd0] sm:$0xff]  ;;  %v176_v13 = vld [vmem:[#allocation2 + $0xc8] sm:$0xff]  ;;  %vm928_vm3 = vcmask 130048   ;;  %vm1091_vm4 = vcmask 254976   ;;  %vm1101_vm5 = vcmask 1024  }
  0x11   :  { %1202 = vmatpush3.msra.mxu0 %v182_v4  ;;  %v175_v14 = vld [vmem:[#allocation2 + $0xc0] sm:$0xff]  ;;  %v1420_v16 = vld [vmem:[#allocation2 + $0x138] sm:$0xff]  ;;  %v1425_v18 = vld [vmem:[#allocation2 + $0x128] sm:$0xff] }
  0x12   :  { %1203 = vmatprep.subr.mxu0 %v181_v5  ;;  %v1115_v15 = vld [vmem:[#allocation2 + $0x101] ss:$0 sm:$0xff]  ;;  %v1429_v19 = vld [vmem:[#allocation2 + $0x130] sm:$0xff]  ;;  %v1431_v20 = vld [vmem:[#allocation2 + $0x118] sm:$0xff] }
  0x13   :  { %96 = vperm.xlu1 %1324, %v26_v3   ;;  %50 = vperm.xlu0 %1323, %v26_v3   ;;  %v1423_v17 = vld [vmem:[#allocation2 + $0x140] sm:$0xff]  ;;  %v1437_v22 = vld [vmem:[#allocation2 + $0x108] sm:$0xff]  ;;  %v1441_v23 = vld [vmem:[#allocation2 + $0x110] sm:$0xff] }
  0x14   :  { %1204 = vmatpush3.msra.mxu0 %v181_v5  ;;  %v1435_v21 = vld [vmem:[#allocation2 + $0x120] sm:$0xff]  ;;  %v31_v28 = vld [vmem:[#allocation2 + $0x90] sm:$0xff]  ;;  %v38_v29 = vld [vmem:[#allocation2 + $0x8] sm:$0xff] }
  0x15   :  { %1205 = vmatprep.subr.mxu0 %v180_v6  ;;  %v37_v24 = vld [vmem:[#allocation2] sm:$0xff]  ;;  %v85_v32 = vld [vmem:[#allocation2 + $0x30] sm:$0xff]  ;;  %v32_v35 = vld [vmem:[#allocation2 + $0x98] sm:$0xff] }
  0x16   :  { %1206 = vmatpush3.msra.mxu0 %v180_v6  ;;  %v127_v36 = vld [vmem:[#allocation2 + $0x60] sm:$0xff]  ;;  %v86_v39 = vld [vmem:[#allocation2 + $0x38] sm:$0xff]  ;;  %v128_v44 = vld [vmem:[#allocation2 + $0x68] sm:$0xff] }
  0x17   :  { %1325 = vset.pattern.permute.xlu1 %v1378_v9  ;;  %55 = vperm.xlu0 %1323, %v27_v7   ;;  %v40_v49 = vld [vmem:[#allocation2 + $0x18] sm:$0xff]  ;;  %v39_v53 = vld [vmem:[#allocation2 + $0x10] sm:$0xff]  ;;  %v88_v55 = vld [vmem:[#allocation2 + $0x48] sm:$0xff] }
  0x18   :  { %134 = vperm.xlu1 %1325, %v25_v2   ;;  %1207 = vmatprep.subr.mxu0 %v179_v8  ;;  %v87_v57 = vld [vmem:[#allocation2 + $0x40] sm:$0xff]  ;;  %v34_v60 = vld [vmem:[#allocation2 + $0xa8] sm:$0xff]  ;;  %v129_v5 = vld [vmem:[#allocation2 + $0x70] sm:$0xff] }
  0x19   :  { %1208 = vmatpush3.msra.mxu0 %v179_v8  ;;  %v33_v63 = vld [vmem:[#allocation2 + $0xa0] sm:$0xff] }
  0x1a   :  { %1209 = vmatprep.subr.mxu0 %v178_v11 }
  0x1b   :  { %60 = vperm.xlu0 %1323, %v28_v10   ;;  %1210 = vmatpush3.msra.mxu0 %v178_v11 }
  0x1c   :  { %138 = vperm.xlu1 %1325, %v26_v3   ;;  %1211 = vmatprep.subr.mxu0 %v177_v12  ;;  %v130_v3 = vld [vmem:[#allocation2 + $0x78] sm:$0xff] }
  0x1d   :  { %1212 = vmatpush3.msra.mxu0 %v177_v12 }
  0x1e   :  { %1213 = vmatprep.subr.mxu0 %v176_v13 }
  0x1f   :  { %1326 = vset.pattern.permute.xlu0 %v1376_v0  ;;  %1214 = vmatpush3.msra.mxu0 %v176_v13 }
  0x20   :  { %1327 = vset.pattern.permute.xlu1 %v1376_v0  ;;  %100 = vperm.xlu0 %1326, %v27_v7  }
  0x21   :  { %104 = vperm.xlu1 %1327, %v28_v10   ;;  %1215 = vmatprep.subr.mxu0 %v175_v14 }
  0x22   :  { %1216 = vmatpush3.msra.mxu0 %v175_v14 }
  0x24   :  { %1329 = vset.pattern.permute.xlu0 %v1378_v9 }
  0x25   :  { %1328 = vset.pattern.permute.xlu1 %v1378_v9  ;;  %146 = vperm.xlu0 %1329, %v28_v10  }
  0x26   :  { %142 = vperm.xlu1 %1328, %v27_v7  }
  0x29   :  { %1331 = vset.pattern.permute.xlu0 %v1377_v1 }
  0x2a   :  { %310 = vrot.lane.b32.xlu1 %v1115_v15, %s1379_s23  ;;  %354 = vrot.lane.b32.xlu0 %v1420_v16, %s1379_s23 }
  0x2b   :  { %1330 = vset.pattern.permute.xlu1 %v1377_v1 }
  0x2e   :  { %356 = vrot.lane.b32.xlu1 %v1423_v17, %s1379_s23  ;;  %350 = vrot.lane.b32.xlu0 %v1425_v18, %s1379_s23 }
  0x32   :  { %352 = vrot.lane.b32.xlu1 %v1429_v19, %s1379_s23  ;;  %346 = vrot.lane.b32.xlu0 %v1431_v20, %s1379_s23 }
  0x36   :  { %348 = vrot.lane.b32.xlu1 %v1435_v21, %s1379_s23  ;;  %342 = vrot.lane.b32.xlu0 %v1437_v22, %s1379_s23 }
  0x3a   :  { %344 = vrot.lane.b32.xlu1 %v1441_v23, %s1379_s23 }
  0x8a   :  { %v93_v25 = vpop.permute.xlu1 %92  ;;  %v46_v26 = vpop.permute.xlu0 %45 }
  0x8b   :  { %v73_v27 = vmul.f32 %v46_v26, %v37_v24  ;;  %v115_v37 = vmul.f32 %v93_v25, %v85_v32  ;;  %v1114_v26 = vld [vmem:[#allocation2 + $0x100] ss:$0 sm:$0xff] }
  0x8d   :  { %v79_v33 = vadd.f32 %v73_v27, %v31_v28 }
  0x8e   :  { %v97_v30 = vpop.permute.xlu1 %96  ;;  %v51_v31 = vpop.permute.xlu0 %50 }
  0x8f   :  { %v74_v34 = vmul.f32 %v51_v31, %v38_v29  ;;  %v121_v43 = vadd.f32 %v115_v37, %v79_v33  ;;  %v116_v45 = vmul.f32 %v97_v30, %v86_v39 }
  0x91   :  { %v80_v41 = vadd.f32 %v74_v34, %v32_v35 }
  0x92   :  { %v56_v38 = vpop.permute.xlu0 %55 }
  0x93   :  { %v135_v40 = vpop.permute.xlu1 %134  ;;  %v122_v50 = vadd.f32 %v116_v45, %v80_v41  ;;  %v75_v59 = vmul.f32 %v56_v38, %v39_v53  ;;  %v30_v53 = vld [vmem:[%s1532_s0 + $0x28] sm:$0xff] }
  0x94   :  { %v157_v42 = vmul.f32 %v135_v40, %v127_v36 }
  0x95   :  { %v81_v6 = vadd.f32 %v75_v59, %v33_v63 }
  0x96   :  { %v61_v46 = vpop.permute.xlu0 %60  ;;  %v163_v47 = vadd.f32 %v157_v42, %v121_v43 }
  0x97   :  { %v139_v48 = vpop.permute.xlu1 %138  ;;  %v76_v56 = vmul.f32 %v61_v46, %v40_v49 }
  0x98   :  { %v158_v51 = vmul.f32 %v139_v48, %v128_v44  ;;  %v169_v52 = vmax.f32 %v163_v47, 0.0 }
  0x99   :  { %v82_v4 = vadd.f32 %v76_v56, %v34_v60  ;;  %v35_v60 = vld [vmem:[#allocation2 + $0xb0] sm:$0xff] }
  0x9a   :  { %v164_v54 = vadd.f32 %v158_v51, %v122_v50  ;;  %1217 = vmatprep.mubr.msk.f32.mxu0 %vm183_vm0, %v169_v52  ;;  %v29_v52 = vld [vmem:[%s1532_s0 + $0x20] sm:$0xff]  ;;  %s1381_s0 = smov 64  }
  0x9b   :  { %v101_v58 = vpop.permute.xlu0 %100 }
  0x9c   :  { %v170_v61 = vmax.f32 %v164_v54, 0.0  ;;  %v105_v62 = vpop.permute.xlu1 %104  ;;  %v117_v2 = vmul.f32 %v101_v58, %v87_v57 }
  0x9d   :  { %v118_v1 = vmul.f32 %v105_v62, %v88_v55 }
  0x9e   :  { %1218 = vmatmul.mubr.msk.f32.vlgmr.msra.gmra.mxu0 %vm183_vm0, %v170_v61  ;;  %v123_v12 = vadd.f32 %v117_v2, %v81_v6  ;;  %v41_v61 = vld [vmem:[#allocation2 + $0x20] sm:$0xff]  ;;  %v42_v2 = vld [vmem:[#allocation2 + $0x28] sm:$0xff] }
  0x9f   :  { %v124_v8 = vadd.f32 %v118_v1, %v82_v4  ;;  %v131_v4 = vld [vmem:[#allocation2 + $0x80] sm:$0xff] }
  0xa0   :  { %v147_v7 = vpop.permute.xlu0 %146 }
  0xa1   :  { %v160_v10 = vmul.f32 %v147_v7, %v130_v3  ;;  %v143_v11 = vpop.permute.xlu1 %142  ;;  %v89_v3 = vld [vmem:[#allocation2 + $0x50] sm:$0xff] }
  0xa2   :  { %v159_v13 = vmul.f32 %v143_v11, %v129_v5 }
  0xa3   :  { %v166_v14 = vadd.f32 %v160_v10, %v124_v8  ;;  %v36_v8 = vld [vmem:[#allocation2 + $0xb8] sm:$0xff] }
  0xa4   :  { %v165_v15 = vadd.f32 %v159_v13, %v123_v12  ;;  %v355_v33 = vpop.permute.xlu0 %354  ;;  %v90_v13 = vld [vmem:[#allocation2 + $0x58] sm:$0xff] }
  0xa5   :  { %v172_v25 = vmax.f32 %v166_v14, 0.0  ;;  %v311_v27 = vpop.permute.xlu1 %310 }
  0xa6   :  { %v171_v24 = vmax.f32 %v165_v15, 0.0 }
  0xa8   :  { %1220 = vmatprep.mubr.msk.f32.mxu0 %vm183_vm0, %v171_v24  ;;  %v351_v37 = vpop.permute.xlu0 %350 }
  0xa9   :  { %1221 = vmatmul.mubr.msk.f32.gmra.mxu0 %vm183_vm0, %v172_v25  ;;  %v357_v32 = vpop.permute.xlu1 %356 }
  0xac   :  { %v347_v44 = vpop.permute.xlu0 %346 }
  0xad   :  { %v353_v34 = vpop.permute.xlu1 %352 }
  0xb0   :  { %v343_v49 = vpop.permute.xlu0 %342 }
  0xb1   :  { %v349_v42 = vpop.permute.xlu1 %348 }
  0xb5   :  { %v345_v47 = vpop.permute.xlu1 %344 }
 0x15e   :  { %v1219_v28 = vpop.f32.mrf.mxu0 }
 0x15f   :  { %v1448_v29 = vadd.f32 %v1219_v28, %v1114_v26 }
 0x160   :  { %v268_v30 = vpop.f32.mrf.mxu0 }
 0x161   :  { %v1450_v31 = vadd.f32 %v1114_v26, %v268_v30 }
 0x163   :  { %1242 = vmatprep.mubr.msk.f32.mxu1 %vm430_vm1, %v1450_v31 }
 0x169   :  { %v1222_v35 = vpop.f32.mrf.mxu0 }
 0x16a   :  { %v314_v36 = vadd.f32 %v1222_v35, %v311_v27 }
 0x16b   :  { %v278_v38 = vpop.f32.mrf.mxu0 }
 0x16c   :  { %v313_v39 = vadd.f32 %v311_v27, %v278_v38  ;;  %v373_v40 = vmul.f32 %v357_v32, %v314_v36  ;;  %v371_v43 = vmul.f32 %v353_v34, %v314_v36  ;;  %v369_v46 = vmul.f32 %v349_v42, %v314_v36  ;;  %v132_v27 = vld [vmem:[#allocation2 + $0x88] sm:$0xff] }
 0x16d   :  { %v367_v50 = vmul.f32 %v345_v47, %v314_v36  ;;  %v550_v42 = vld [vmem:[#allocation2 + $0x188] sm:$0xff]  ;;  %v544_v47 = vld [vmem:[#allocation2 + $0x158] sm:$0xff] }
 0x16e   :  { %428 = vrot.lane.b32.xlu1 %v373_v40, %s1380_s24  ;;  %v372_v41 = vmul.f32 %v355_v33, %v313_v39  ;;  %v370_v45 = vmul.f32 %v351_v37, %v313_v39  ;;  %v368_v48 = vmul.f32 %v347_v44, %v313_v39  ;;  %v366_v51 = vmul.f32 %v343_v49, %v313_v39  ;;  %v551_v40 = vld [vmem:[#allocation2 + $0x190] sm:$0xff]  ;;  %v548_v44 = vld [vmem:[#allocation2 + $0x178] sm:$0xff] }
 0x16f   :  { %1245 = vmatprep.subr.mxu0 %v551_v40 }
 0x170   :  { %426 = vrot.lane.b32.xlu0 %v372_v41, %s1380_s24  ;;  %v1116_v41 = vld [vmem:[#allocation2 + $0x102] ss:$0 sm:$0xff]  ;;  %1246 = vmatpush3.msra.mxu0 %v551_v40 }
 0x171   :  { %1247 = vmatprep.subr.mxu0 %v550_v42 }
 0x172   :  { %424 = vrot.lane.b32.xlu1 %v371_v43, %s1380_s24  ;;  %1248 = vmatpush3.msra.mxu0 %v550_v42  ;;  %v549_v43 = vld [vmem:[#allocation2 + $0x180] sm:$0xff] }
 0x173   :  { %1249 = vmatprep.subr.mxu0 %v549_v43 }
 0x174   :  { %422 = vrot.lane.b32.xlu0 %v370_v45, %s1380_s24  ;;  %1250 = vmatpush3.msra.mxu0 %v549_v43  ;;  %v547_v45 = vld [vmem:[#allocation2 + $0x170] sm:$0xff] }
 0x175   :  { %1251 = vmatprep.subr.mxu0 %v548_v44 }
 0x176   :  { %420 = vrot.lane.b32.xlu1 %v369_v46, %s1380_s24  ;;  %1252 = vmatpush3.msra.mxu0 %v548_v44  ;;  %v545_v46 = vld [vmem:[#allocation2 + $0x160] sm:$0xff] }
 0x177   :  { %1253 = vmatprep.subr.mxu0 %v547_v45 }
 0x178   :  { %418 = vrot.lane.b32.xlu0 %v368_v48, %s1380_s24  ;;  %1254 = vmatpush3.msra.mxu0 %v547_v45 }
 0x17a   :  { %416 = vrot.lane.b32.xlu1 %v367_v50, %s1380_s24 }
 0x17c   :  { %414 = vrot.lane.b32.xlu0 %v366_v51, %s1380_s24 }
 0x17e   :  { %65 = vperm.xlu1 %1330, %v29_v52  }
 0x180   :  { %70 = vperm.xlu0 %1331, %v30_v53  }
 0x182   :  { %1332 = vset.pattern.permute.xlu1 %v1376_v0 }
 0x183   :  { %108 = vperm.xlu1 %1332, %v29_v52  }
 0x184   :  { %1333 = vset.pattern.permute.xlu0 %v1378_v9 }
 0x185   :  { %150 = vperm.xlu0 %1333, %v29_v52  }
 0x187   :  { %112 = vperm.xlu1 %1332, %v30_v53  }
 0x18b   :  { %1334 = vset.pattern.permute.xlu1 %v1378_v9 }
 0x18c   :  { %154 = vperm.xlu1 %1334, %v30_v53  }
 0x1e0   :  { %v429_v54 = vpop.permute.xlu1 %428 }
 0x1e1   :  { %1226 = vmatprep.subr.msk.mxu1 %vm430_vm1, %v429_v54 }
 0x1e2   :  { %1227 = vmatpush3.xpose.msk.msra.mxu1 %vm430_vm1, %v429_v54  ;;  %v427_v55 = vpop.permute.xlu0 %426 }
 0x1e3   :  { %1228 = vmatprep.subr.msk.mxu1 %vm430_vm1, %v427_v55 }
 0x1e4   :  { %v425_v56 = vpop.permute.xlu1 %424 }
 0x1e6   :  { %1229 = vmatpush3.xpose.msk.msra.mxu1 %vm430_vm1, %v427_v55  ;;  %v423_v0 = vpop.permute.xlu0 %422 }
 0x1e7   :  { %1230 = vmatprep.subr.msk.mxu1 %vm430_vm1, %v425_v56 }
 0x1e8   :  { %v421_v9 = vpop.permute.xlu1 %420 }
 0x1ea   :  { %1231 = vmatpush3.xpose.msk.msra.mxu1 %vm430_vm1, %v425_v56  ;;  %v419_v57 = vpop.permute.xlu0 %418 }
 0x1eb   :  { %1232 = vmatprep.subr.msk.mxu1 %vm430_vm1, %v423_v0 }
 0x1ec   :  { %v417_v58 = vpop.permute.xlu1 %416 }
 0x1ee   :  { %1233 = vmatpush3.xpose.msk.msra.mxu1 %vm430_vm1, %v423_v0  ;;  %v415_v59 = vpop.permute.xlu0 %414 }
 0x1ef   :  { %1234 = vmatprep.subr.msk.mxu1 %vm430_vm1, %v421_v9 }
 0x1f2   :  { %1235 = vmatpush3.xpose.msk.msra.mxu1 %vm430_vm1, %v421_v9 }
 0x1f3   :  { %1236 = vmatprep.subr.msk.mxu1 %vm430_vm1, %v419_v57 }
 0x1f6   :  { %1237 = vmatpush3.xpose.msk.msra.mxu1 %vm430_vm1, %v419_v57 }
 0x1f7   :  { %1238 = vmatprep.subr.msk.mxu1 %vm430_vm1, %v417_v58 }
 0x1f9   :  { %v66_v62 = vpop.permute.xlu1 %65 }
 0x1fa   :  { %1239 = vmatpush3.xpose.msk.msra.mxu1 %vm430_vm1, %v417_v58  ;;  %v77_v1 = vmul.f32 %v66_v62, %v41_v61  ;;  %v540_v62 = vld [vmem:[#allocation2 + $0x148] sm:$0xff] }
 0x1fb   :  { %1240 = vmatprep.subr.msk.mxu1 %vm430_vm1, %v415_v59  ;;  %v71_v63 = vpop.permute.xlu0 %70 }
 0x1fc   :  { %v83_v5 = vadd.f32 %v77_v1, %v35_v60  ;;  %v78_v6 = vmul.f32 %v71_v63, %v42_v2  ;;  %v541_v2 = vld [vmem:[#allocation2 + $0x150] sm:$0xff] }
 0x1fe   :  { %1241 = vmatpush3.xpose.msk.msra.mxu1 %vm430_vm1, %v415_v59  ;;  %v109_v7 = vpop.permute.xlu1 %108  ;;  %v84_v15 = vadd.f32 %v78_v6, %v36_v8 }
 0x1ff   :  { %v119_v11 = vmul.f32 %v109_v7, %v89_v3 }
 0x200   :  { %v151_v10 = vpop.permute.xlu0 %150 }
 0x201   :  { %1243 = vmatmul.mubr.msk.f32.vlgmr.msra.gmra.mxu1 %vm430_vm1, %v1448_v29  ;;  %v161_v12 = vmul.f32 %v151_v10, %v131_v4  ;;  %v125_v14 = vadd.f32 %v119_v11, %v83_v5 }
 0x202   :  { %v113_v24 = vpop.permute.xlu1 %112 }
 0x203   :  { %v120_v25 = vmul.f32 %v113_v24, %v90_v13  ;;  %v167_v26 = vadd.f32 %v161_v12, %v125_v14 }
 0x205   :  { %v126_v28 = vadd.f32 %v120_v25, %v84_v15  ;;  %v173_v30 = vmax.f32 %v167_v26, 0.0 }
 0x207   :  { %v155_v32 = vpop.permute.xlu1 %154  ;;  %1223 = vmatprep.mubr.msk.f32.mxu0 %vm183_vm0, %v173_v30 }
 0x208   :  { %v162_v33 = vmul.f32 %v155_v32, %v132_v27 }
 0x20a   :  { %v168_v34 = vadd.f32 %v162_v33, %v126_v28 }
 0x20c   :  { %v174_v35 = vmax.f32 %v168_v34, 0.0 }
 0x20e   :  { %1224 = vmatmul.mubr.msk.f32.gmra.mxu0 %vm183_vm0, %v174_v35 }
 0x2c1   :  { %v1244_v36 = vpop.f32.mrf.mxu1 }
 0x2c2   :  { %v531_v37 = vsel %vm183_vm0, %v1244_v36, -inf }
 0x2c3   :  { %532 = vmax.xlane.f32.xlu0 %v531_v37  ;;  %v519_v38 = vpop.f32.mrf.mxu1 }
 0x2c4   :  { %v528_v39 = vsel %vm183_vm0, %v519_v38, -inf }
 0x2c5   :  { %529 = vmax.xlane.f32.xlu1 %v528_v39 }
 0x2d6   :  { %388 = vrot.lane.b32.xlu1 %v1423_v17, %s1381_s0  ;;  %v546_v17 = vld [vmem:[#allocation2 + $0x168] sm:$0xff] }
 0x2d7   :  { %1255 = vmatprep.subr.mxu0 %v546_v17 }
 0x2d8   :  { %1256 = vmatpush3.msra.mxu0 %v546_v17 }
 0x2d9   :  { %321 = vrot.lane.b32.xlu0 %v1116_v41, %s1381_s0  ;;  %1257 = vmatprep.subr.mxu0 %v545_v46 }
 0x2da   :  { %386 = vrot.lane.b32.xlu1 %v1420_v16, %s1381_s0  ;;  %1258 = vmatpush3.msra.mxu0 %v545_v46 }
 0x2db   :  { %1259 = vmatprep.subr.mxu0 %v544_v47 }
 0x2dc   :  { %1260 = vmatpush3.msra.mxu0 %v544_v47 }
 0x2dd   :  { %384 = vrot.lane.b32.xlu0 %v1429_v19, %s1381_s0 }
 0x2de   :  { %382 = vrot.lane.b32.xlu1 %v1425_v18, %s1381_s0  ;;  %v1225_v18 = vpop.f32.mrf.mxu0 }
 0x2e0   :  { %v288_v51 = vpop.f32.mrf.mxu0 }
 0x2e1   :  { %380 = vrot.lane.b32.xlu0 %v1435_v21, %s1381_s0 }
 0x2e2   :  { %378 = vrot.lane.b32.xlu1 %v1431_v20, %s1381_s0 }
 0x2e5   :  { %376 = vrot.lane.b32.xlu0 %v1441_v23, %s1381_s0 }
 0x2e6   :  { %374 = vrot.lane.b32.xlu1 %v1437_v22, %s1381_s0 }
 0x34c   :  { %v533_v16 = vpop.xlane.xlu0 %532 }
 0x34d   :  { %v535_v19 = vsub.f32 %v1244_v36, %v533_v16  ;;  %v795_v16 = vld [vmem:[#allocation2 + $0x1b0] sm:$0xff] }
 0x34e   :  { %v530_v48 = vpop.xlane.xlu1 %529 }
 0x34f   :  { %v538_v49 = vmul.f32 1.442695, %v535_v19  ;;  %v534_v50 = vsub.f32 %v519_v38, %v530_v48  ;;  %v793_v19 = vld [vmem:[#allocation2 + $0x1a0] sm:$0xff] }
 0x350   :  { %v322_v21 = vpop.permute.xlu0 %321 }
 0x351   :  { %v536_v52 = vmul.f32 1.442695, %v534_v50  ;;  %v325_v53 = vadd.f32 %v1225_v18, %v322_v21  ;;  %1335 = vpow2.f32 %v538_v49  ;;  %v324_v54 = vadd.f32 %v322_v21, %v288_v51  ;;  %v794_v18 = vld [vmem:[#allocation2 + $0x1a8] sm:$0xff] }
 0x352   :  { %v389_v20 = vpop.permute.xlu1 %388 }
 0x353   :  { %1337 = vpow2.f32 %v536_v52  ;;  %v405_v55 = vmul.f32 %v389_v20, %v325_v53  ;;  %v1131_v20 = vld [vmem:[#allocation2 + $0x1c1] ss:$0 sm:$0xff] }
 0x354   :  { %v385_v56 = vpop.permute.xlu0 %384 }
 0x355   :  { %659 = vrot.lane.b32.xlu0 %v405_v55, %s1381_s0  ;;  %v403_v23 = vmul.f32 %v385_v56, %v325_v53  ;;  %v1132_v55 = vld [vmem:[#allocation2 + $0x1c2] ss:$0 sm:$0xff] }
 0x356   :  { %v387_v22 = vpop.permute.xlu1 %386 }
 0x357   :  { %v404_v0 = vmul.f32 %v387_v22, %v324_v54 }
 0x358   :  { %v381_v9 = vpop.permute.xlu0 %380 }
 0x359   :  { %657 = vrot.lane.b32.xlu1 %v404_v0, %s1381_s0  ;;  %655 = vrot.lane.b32.xlu0 %v403_v23, %s1381_s0  ;;  %v401_v57 = vmul.f32 %v381_v9, %v325_v53 }
 0x35a   :  { %v383_v58 = vpop.permute.xlu1 %382 }
 0x35b   :  { %v402_v59 = vmul.f32 %v383_v58, %v324_v54  ;;  %v1133_v58 = vld [vmem:[#allocation2 + $0x1c0] ss:$0 sm:$0xff] }
 0x35c   :  { %v377_v60 = vpop.permute.xlu0 %376 }
 0x35d   :  { %653 = vrot.lane.b32.xlu1 %v402_v59, %s1381_s0  ;;  %651 = vrot.lane.b32.xlu0 %v401_v57, %s1381_s0  ;;  %v399_v61 = vmul.f32 %v377_v60, %v325_v53 }
 0x35e   :  { %v379_v63 = vpop.permute.xlu1 %378  ;;  %v1336_v1 = vpop.eup %1335 }
 0x35f   :  { %v400_v3 = vmul.f32 %v379_v63, %v324_v54  ;;  %v543_v6 = vmul.f32 %v1336_v1, %v541_v2 }
 0x360   :  { %v1338_v4 = vpop.eup %1337 }
 0x361   :  { %v542_v5 = vmul.f32 %v1338_v4, %v540_v62  ;;  %649 = vrot.lane.b32.xlu1 %v400_v3, %s1381_s0  ;;  %647 = vrot.lane.b32.xlu0 %v399_v61, %s1381_s0 }
 0x362   :  { %v375_v7 = vpop.permute.xlu1 %374 }
 0x363   :  { %1261 = vmatprep.mubr.msk.f32.mxu0 %vm183_vm0, %v542_v5  ;;  %v398_v8 = vmul.f32 %v375_v7, %v324_v54 }
 0x364   :  { %1262 = vmatmul.mubr.msk.f32.vlgmr.msra.gmra.mxu0 %vm183_vm0, %v543_v6 }
 0x365   :  { %645 = vrot.lane.b32.xlu1 %v398_v8, %s1381_s0 }
 0x3c7   :  { %v660_v10 = vpop.permute.xlu0 %659 }
 0x3c8   :  { %1264 = vmatprep.subr.mxu0 %v660_v10 }
 0x3c9   :  { %1265 = vmatpush3.msra.mxu0 %v660_v10 }
 0x3cb   :  { %v658_v11 = vpop.permute.xlu1 %657  ;;  %v656_v12 = vpop.permute.xlu0 %655 }
 0x3cc   :  { %1266 = vmatprep.subr.mxu0 %v658_v11 }
 0x3cd   :  { %1267 = vmatpush3.msra.mxu0 %v658_v11 }
 0x3ce   :  { %1268 = vmatprep.subr.mxu0 %v656_v12 }
 0x3cf   :  { %v654_v13 = vpop.permute.xlu1 %653  ;;  %1269 = vmatpush3.msra.mxu0 %v656_v12  ;;  %v652_v14 = vpop.permute.xlu0 %651 }
 0x3d0   :  { %1270 = vmatprep.subr.mxu0 %v654_v13 }
 0x3d1   :  { %1271 = vmatpush3.msra.mxu0 %v654_v13 }
 0x3d2   :  { %1272 = vmatprep.subr.mxu0 %v652_v14 }
 0x3d3   :  { %v650_v15 = vpop.permute.xlu1 %649  ;;  %1273 = vmatpush3.msra.mxu0 %v652_v14  ;;  %v648_v24 = vpop.permute.xlu0 %647 }
 0x3d4   :  { %1274 = vmatprep.subr.mxu0 %v650_v15 }
 0x3d5   :  { %1275 = vmatpush3.msra.mxu0 %v650_v15 }
 0x3d6   :  { %1276 = vmatprep.subr.mxu0 %v648_v24 }
 0x3d7   :  { %v646_v25 = vpop.permute.xlu1 %645  ;;  %1277 = vmatpush3.msra.mxu0 %v648_v24 }
 0x3d8   :  { %1278 = vmatprep.subr.mxu0 %v646_v25 }
 0x3d9   :  { %1279 = vmatpush3.msra.mxu0 %v646_v25  ;;  %v1382_v25 = vmov 0.0  }
 0x424   :  { %v1263_v26 = vpop.f32.mrf.mxu0 }
 0x425   :  { %1339 = vrcp.f32 %v1263_v26 }
 0x426   :  { %v624_v27 = vpop.f32.mrf.mxu0 }
 0x427   :  { %1341 = vrcp.f32 %v624_v27 }
 0x432   :  { %v1340_v28 = vpop.eup %1339 }
 0x433   :  { %v636_v33 = vmul.f32 %v1340_v28, %v543_v6 }
 0x434   :  { %v1342_v30 = vpop.eup %1341 }
 0x435   :  { %v634_v32 = vmul.f32 %v1342_v30, %v542_v5 }
 0x437   :  { %1280 = vmatprep.mubr.msk.f32.mxu0 %vm183_vm0, %v634_v32 }
 0x438   :  { %1281 = vmatmul.mubr.msk.f32.vlgmr.msra.gmra.mxu0 %vm183_vm0, %v636_v33 }
 0x4f8   :  { %v1282_v34 = vpop.f32.mrf.mxu0 }
 0x4f9   :  { %v751_v35 = vadd.f32 %v1282_v34, %v1448_v29 }
 0x4fa   :  { %v741_v36 = vpop.f32.mrf.mxu0 }
 0x4fb   :  { %v750_v37 = vadd.f32 %v741_v36, %v1450_v31  ;;  %v757_v38 = vsel %vm430_vm1, %v751_v35, 0.0  ;;  %v796_v31 = vld [vmem:[#allocation2 + $0x1b8] sm:$0xff] }
 0x4fc   :  { %758 = vadd.xlane.f32.xlu1 %v757_v38  ;;  %1283 = vmatprep.subr.mxu1 %v796_v31  ;;  %v1137_v38 = vld [vmem:[#allocation2 + $0x1c4] ss:$0 sm:$0xff] }
 0x4fd   :  { %v754_v39 = vsel %vm430_vm1, %v750_v37, 0.0  ;;  %1284 = vmatpush3.msra.mxu1 %v796_v31 }
 0x4fe   :  { %755 = vadd.xlane.f32.xlu0 %v754_v39  ;;  %1285 = vmatprep.subr.mxu1 %v795_v16 }
 0x4ff   :  { %1286 = vmatpush3.msra.mxu1 %v795_v16  ;;  %v1139_v16 = vld [vmem:[#allocation2 + $0x1e8] ss:$0 sm:$0xff] }
 0x500   :  { %1287 = vmatprep.subr.mxu1 %v794_v18 }
 0x501   :  { %1288 = vmatpush3.msra.mxu1 %v794_v18 }
 0x502   :  { %1289 = vmatprep.subr.mxu1 %v793_v19 }
 0x503   :  { %1290 = vmatpush3.msra.mxu1 %v793_v19 }
 0x504   :  { %1294 = vmatprep.subr.mxu1 %v1382_v25 }
 0x585   :  { %v759_v40 = vpop.xlane.xlu1 %758 }
 0x586   :  { %v762_v41 = vmul.f32 0.03125, %v759_v40 }
 0x587   :  { %v756_v42 = vpop.xlane.xlu0 %755 }
 0x588   :  { %v761_v43 = vmul.f32 0.03125, %v756_v42  ;;  %v764_v44 = vsub.f32 %v751_v35, %v762_v41  ;;  %v1136_v35 = vld [vmem:[#allocation2 + $0x1c3] ss:$0 sm:$0xff] }
 0x58a   :  { %v763_v45 = vsub.f32 %v750_v37, %v761_v43  ;;  %v766_v47 = vmul.f32 %v764_v44, %v764_v44 }
 0x58c   :  { %v765_v17 = vmul.f32 %v763_v45, %v763_v45  ;;  %v770_v29 = vsel %vm430_vm1, %v766_v47, 0.0  ;;  %v1002_v47 = vld [vmem:[#allocation2 + $0x1c8] sm:$0xff] }
 0x58e   :  { %v767_v46 = vsel %vm430_vm1, %v765_v17, 0.0  ;;  %v1004_v17 = vld [vmem:[#allocation2 + $0x1d8] sm:$0xff] }
 0x58f   :  { %768 = vadd.xlane.f32.xlu0 %v767_v46  ;;  %v1003_v46 = vld [vmem:[#allocation2 + $0x1d0] sm:$0xff] }
 0x593   :  { %771 = vadd.xlane.f32.xlu0 %v770_v29 }
 0x618   :  { %v769_v48 = vpop.xlane.xlu0 %768 }
 0x619   :  { %v773_v49 = vmul.f32 0.03125, %v769_v48 }
 0x61b   :  { %v775_v50 = vadd.f32 1e-05, %v773_v49  ;;  %v1141_v49 = vld [vmem:[#allocation2 + $0x1e9] ss:$0 sm:$0xff] }
 0x61c   :  { %v772_v21 = vpop.xlane.xlu0 %771 }
 0x61d   :  { %1343 = vrsqrt.f32 %v775_v50  ;;  %v774_v51 = vmul.f32 0.03125, %v772_v21 }
 0x61f   :  { %v776_v52 = vadd.f32 1e-05, %v774_v51 }
 0x621   :  { %1345 = vrsqrt.f32 %v776_v52  ;;  %v1142_v52 = vld [vmem:[#allocation2 + $0x1ea] ss:$0 sm:$0xff] }
 0x62a   :  { %v1344_v53 = vpop.eup %1343 }
 0x62b   :  { %v779_v54 = vmul.f32 %v1344_v53, %v763_v45  ;;  %v1005_v45 = vld [vmem:[#allocation2 + $0x1e0] sm:$0xff] }
 0x62d   :  { %v785_v56 = vmul.f32 %v1131_v20, %v779_v54 }
 0x62e   :  { %v1346_v23 = vpop.eup %1345 }
 0x62f   :  { %v780_v22 = vmul.f32 %v1346_v23, %v764_v44  ;;  %v791_v0 = vadd.f32 %v1132_v55, %v785_v56  ;;  %v927_v44 = vld [vmem:[#allocation2 + $0x198] sm:$0x3] }
 0x631   :  { %v786_v9 = vmul.f32 %v1131_v20, %v780_v22  ;;  %1291 = vmatprep.mubr.msk.f32.mxu1 %vm430_vm1, %v791_v0 }
 0x633   :  { %v792_v57 = vadd.f32 %v1132_v55, %v786_v9 }
 0x635   :  { %1292 = vmatmul.mubr.msk.f32.vlgmr.msra.gmra.mxu1 %vm430_vm1, %v792_v57 }
 0x636   :  { %1298 = vmatprep.mubr.msk.f32.mxu1 %vm1383_vm2, %v1382_v25 }
 0x6f5   :  { %v1293_v59 = vpop.f32.mrf.mxu1 }
 0x6f6   :  { %v880_v60 = vadd.f32 %v1293_v59, %v1133_v58 }
 0x6f7   :  { %v874_v61 = vpop.f32.mrf.mxu1 }
 0x6f8   :  { %v884_v62 = vmax.f32 %v880_v60, 0.0  ;;  %v875_v63 = vadd.f32 %v1133_v58, %v874_v61 }
 0x6fa   :  { %v883_v1 = vmax.f32 %v875_v63, 0.0  ;;  %v886_v2 = vadd.f32 %v884_v62, %v792_v57 }
 0x6fc   :  { %v892_v3 = vsel %vm430_vm1, %v886_v2, 0.0  ;;  %v885_v4 = vadd.f32 %v883_v1, %v791_v0 }
 0x6fd   :  { %893 = vadd.xlane.f32.xlu1 %v892_v3 }
 0x6fe   :  { %v889_v5 = vsel %vm430_vm1, %v885_v4, 0.0 }
 0x6ff   :  { %890 = vadd.xlane.f32.xlu0 %v889_v5 }
 0x786   :  { %v894_v6 = vpop.xlane.xlu1 %893 }
 0x787   :  { %v896_v7 = vmul.f32 0.03125, %v894_v6 }
 0x788   :  { %v891_v8 = vpop.xlane.xlu0 %890 }
 0x789   :  { %v898_v10 = vsub.f32 %v886_v2, %v896_v7  ;;  %v895_v11 = vmul.f32 0.03125, %v891_v8 }
 0x78b   :  { %v897_v12 = vsub.f32 %v885_v4, %v895_v11  ;;  %v900_v13 = vmul.f32 %v898_v10, %v898_v10 }
 0x78d   :  { %v904_v14 = vsel %vm430_vm1, %v900_v13, 0.0  ;;  %v899_v15 = vmul.f32 %v897_v12, %v897_v12 }
 0x78e   :  { %905 = vadd.xlane.f32.xlu1 %v904_v14 }
 0x78f   :  { %v901_v24 = vsel %vm430_vm1, %v899_v15, 0.0 }
 0x790   :  { %902 = vadd.xlane.f32.xlu0 %v901_v24 }
 0x817   :  { %v906_v26 = vpop.xlane.xlu1 %905 }
 0x818   :  { %v908_v27 = vmul.f32 0.03125, %v906_v26 }
 0x819   :  { %v903_v28 = vpop.xlane.xlu0 %902 }
 0x81a   :  { %v910_v30 = vadd.f32 1e-05, %v908_v27  ;;  %v907_v32 = vmul.f32 0.03125, %v903_v28 }
 0x81c   :  { %1347 = vrsqrt.f32 %v910_v30  ;;  %v909_v33 = vadd.f32 1e-05, %v907_v32 }
 0x81e   :  { %1349 = vrsqrt.f32 %v909_v33 }
 0x829   :  { %v1348_v34 = vpop.eup %1347 }
 0x82a   :  { %v914_v36 = vmul.f32 %v1348_v34, %v898_v10 }
 0x82b   :  { %v1350_v37 = vpop.eup %1349 }
 0x82c   :  { %v920_v39 = vmul.f32 %v1136_v35, %v914_v36  ;;  %v913_v40 = vmul.f32 %v1350_v37, %v897_v12 }
 0x82e   :  { %v926_v41 = vadd.f32 %v1137_v38, %v920_v39  ;;  %v919_v42 = vmul.f32 %v1136_v35, %v913_v40 }
 0x830   :  { %1295 = vmatpush3.msra.mxu1 %v926_v41  ;;  %v925_v43 = vadd.f32 %v1137_v38, %v919_v42 }
 0x831   :  { %1296 = vmatprep.subr.mxu1 %v1382_v25 }
 0x832   :  { %1297 = vmatpush3.msra.mxu1 %v925_v43 }
 0x833   :  { %1299 = vmatmul.mubr.msk.f32.vlgmr.msra.gmra.mxu1 %vm928_vm3, %v927_v44  ;;  %1301 = vmatprep.subr.mxu1 %v1382_v25 }
 0x834   :  { %1302 = vmatpush3.msra.mxu1 %v1005_v45  ;;  %1309 = vmatprep.mubr.msk.f32.mxu1 %vm1383_vm2, %v1382_v25 }
 0x835   :  { %1303 = vmatprep.subr.mxu1 %v1382_v25 }
 0x836   :  { %1304 = vmatpush3.msra.mxu1 %v1004_v17 }
 0x837   :  { %1305 = vmatprep.subr.mxu1 %v1382_v25 }
 0x838   :  { %1306 = vmatpush3.msra.mxu1 %v1003_v46 }
 0x839   :  { %1307 = vmatprep.subr.mxu1 %v1382_v25 }
 0x83a   :  { %1308 = vmatpush3.msra.mxu1 %v1002_v47 }
 0x8f3   :  { %v998_v29 = vpop.f32.mrf.mxu1 }
 0x8f4   :  { %1310 = vmatmul.mubr.msk.f32.vlgmr.msra.gmra.mxu1 %vm430_vm1, %v998_v29 }
 0x8f5   :  { %v1300_v31 = vpop.f32.mrf.mxu1 }
 0x9b4   :  { %v1080_v18 = vpop.f32.mrf.mxu1 }
 0x9b5   :  { %v1081_v19 = vadd.f32 %v1139_v16, %v1080_v18 }
 0x9b6   :  { %v1311_v48 = vpop.f32.mrf.mxu1 }
 0x9b7   :  { %v1084_v50 = vmax.f32 %v1081_v19, 0.0 }
 0x9b9   :  { %v1090_v21 = vmul.f32 %v1141_v49, %v1084_v50 }
 0x9bb   :  { %v1092_v51 = vsel %vm1091_vm4, %v1090_v21, 0.0 }
 0x9bc   :  { %1093 = vadd.xlane.f32.xlu1 %v1092_v51 }
 0xa45   :  { %v1094_v53 = vpop.xlane.xlu1 %1093 }
 0xa46   :  { %v1100_v20 = vadd.f32 %v1142_v52, %v1094_v53 }
 0xa48   :  { %1102 = vst.msk [vmem:[%s1534_s2] sm:$0x3] %vm1101_vm5, %v1100_v20 }
 0xa49   :  { %1107 = vsyncpa [#allocation3], 1 }

</bundles_post_ra>
